<compile_context>
chip_gen: v7x
topology: tpu7x:2x2x1
jax: 0.10.0
libtpu: 0.0.40
codegen_flags: <defaults>
</compile_context>

<pallas_src>
import jax
import jax.numpy as jnp
from jax.experimental import pallas as pl
from jax.experimental.pallas import tpu as pltpu


def _round_up(n, m):
    return ((n + m - 1) // m) * m


def _mlp_kernel(scale_ref, xT_ref, w1_ref, b1_ref, w2_ref, b2_ref, w3_ref, b3_ref, oT_ref):
    # fc1: h1^T = W1 @ x^T  (bf16 operands, f32 accumulation on the MXU)
    h1 = jnp.dot(w1_ref[...], xT_ref[...], preferred_element_type=jnp.float32)
    h1 = jnp.maximum(h1 + b1_ref[...], 0.0).astype(jnp.bfloat16)
    # fc2: h2^T = W2 @ h1^T
    h2 = jnp.dot(w2_ref[...], h1, preferred_element_type=jnp.float32)
    h2 = jnp.maximum(h2 + b2_ref[...], 0.0).astype(jnp.bfloat16)
    # fc3 (no output activation by default), then runtime scale from SMEM
    out = jnp.dot(w3_ref[...], h2, preferred_element_type=jnp.float32)
    oT_ref[...] = ((out + b3_ref[...]) * scale_ref[0, 0]).astype(oT_ref.dtype)


def init_params(key, num_input, num_hidden, num_output=2):
    """PyTorch nn.Linear-style init: W is [out, in], b is [out], uniform(+-1/sqrt(fan_in))."""
    keys = jax.random.split(key, 6)

    def linear(kw, kb, fan_in, fan_out):
        bound = 1.0 / (fan_in ** 0.5)
        w = jax.random.uniform(kw, (fan_out, fan_in), jnp.float32, -bound, bound)
        b = jax.random.uniform(kb, (fan_out,), jnp.float32, -bound, bound)
        return w, b

    w1, b1 = linear(keys[0], keys[1], num_input, num_hidden)
    w2, b2 = linear(keys[2], keys[3], num_hidden, num_hidden)
    w3, b3 = linear(keys[4], keys[5], num_hidden, num_output)
    return dict(w1=w1, b1=b1, w2=w2, b2=b2, w3=w3, b3=b3)


def prepare_params(params):
    """One-time padding + bf16 cast of the weights (hoisted out of the per-call path).

    Weights stay in the PyTorch [out, in] layout (no transpose needed for the
    batch-on-lanes dataflow). Padded rows/cols are zero, which is numerically inert:
    relu(0 + 0) = 0 in padded hidden rows and padded contraction entries contribute 0.
    """
    H, num_input = params["w1"].shape
    num_output = params["w3"].shape[0]
    in_pad = _round_up(num_input, 8)     # sublane alignment of x^T / W1 contraction
    H_pad = _round_up(H, 128)            # hidden dim: MXU/lane friendly
    O_pad = _round_up(num_output, 8)     # output rows: sublane alignment only (lane-dense batch)

    def padw(w, rows, cols):
        return jnp.pad(w, ((0, rows - w.shape[0]), (0, cols - w.shape[1]))).astype(jnp.bfloat16)

    def padb(b, rows):
        return jnp.pad(b.reshape(-1, 1), ((0, rows - b.shape[0]), (0, 0))).astype(jnp.float32)

    return dict(
        w1=padw(params["w1"], H_pad, in_pad), b1=padb(params["b1"], H_pad),
        w2=padw(params["w2"], H_pad, H_pad), b2=padb(params["b2"], H_pad),
        w3=padw(params["w3"], O_pad, H_pad), b3=padb(params["b3"], O_pad),
        dims=dict(num_input=num_input, num_hidden=H, num_output=num_output,
                  in_pad=in_pad, H_pad=H_pad, O_pad=O_pad),
    )


def ratio_estimator_forward(x, prepared, output_scale=1.0, max_block_batch=512):
    """Fused RatioEstimator forward in one Pallas kernel.

    x: [B, num_input] float32
    prepared: output of prepare_params() (padded, bf16-cast weights + f32 biases)
    """
    d = prepared["dims"]
    B, num_input = x.shape
    assert num_input == d["num_input"], "x feature dim does not match prepared params"
    in_pad, H_pad, O_pad = d["in_pad"], d["H_pad"], d["O_pad"]
    num_output = d["num_output"]

    LANE = 128
    # Batch tile on the lane axis: aim for >=4 grid steps (v7x megacore + pipelining),
    # cap at max_block_batch (default 512) so staged h1/h2 stay small; 128-aligned.
    max_block_batch = max(LANE, _round_up(max_block_batch, LANE))
    TB = min(max_block_batch, max(LANE, _round_up(pl.cdiv(B, 4), LANE)))
    B_pad = _round_up(B, TB)

    # Batch-on-lanes: x^T is [in_pad, B_pad] bf16 (lane-dense reads).
    x_t = jnp.pad(x.T.astype(jnp.bfloat16), ((0, in_pad - num_input), (0, B_pad - B)))
    scale = jnp.asarray(output_scale, jnp.float32).reshape(1, 1)

    grid = (B_pad // TB,)

    flops = 2 * B_pad * (in_pad * H_pad + H_pad * H_pad + H_pad * O_pad)
    bytes_accessed = (
        2 * (in_pad * B_pad + H_pad * in_pad + H_pad * H_pad + O_pad * H_pad)   # bf16
        + 4 * (O_pad * B_pad + 2 * H_pad + O_pad + 1)                            # f32
    )

    # VMEM budget guard (scaled-up H / TB must not blow v7x 64 MiB or v5e 16 MiB scoped default).
    weight_vmem = 2 * (H_pad * in_pad + H_pad * H_pad + O_pad * H_pad)   # bf16 resident weights
    bias_vmem = 4 * (2 * H_pad + O_pad)
    stream_vmem = 2 * (in_pad * TB * 2) + 2 * (O_pad * TB * 4)           # double-buffered x / out
    inter_vmem = 2 * H_pad * TB * (4 + 2)                                # h1/h2 f32 + bf16 staging
    needed = 2 * (weight_vmem + bias_vmem) + stream_vmem + inter_vmem
    vmem_limit = int(min(max(2 * needed, 16 * 1024 * 1024), 64 * 1024 * 1024))

    out_t = pl.pallas_call(
        _mlp_kernel,
        out_shape=jax.ShapeDtypeStruct((O_pad, B_pad), jnp.float32),
        grid=grid,
        in_specs=[
            # runtime scale scalar lives in SMEM (no recompile per value)
            pl.BlockSpec(memory_space=pltpu.MemorySpace.SMEM),
            # x^T: streamed per batch tile (auto double-buffered), batch on lanes
            pl.BlockSpec((in_pad, TB), lambda i: (0, i)),
            # weights / biases: constant index_map -> VMEM-resident across the grid
            pl.BlockSpec((H_pad, in_pad), lambda i: (0, 0)),
            pl.BlockSpec((H_pad, 1), lambda i: (0, 0)),
            pl.BlockSpec((H_pad, H_pad), lambda i: (0, 0)),
            pl.BlockSpec((H_pad, 1), lambda i: (0, 0)),
            pl.BlockSpec((O_pad, H_pad), lambda i: (0, 0)),
            pl.BlockSpec((O_pad, 1), lambda i: (0, 0)),
        ],
        out_specs=pl.BlockSpec((O_pad, TB), lambda i: (0, i)),
        compiler_params=pltpu.CompilerParams(
            dimension_semantics=("parallel",),
            vmem_limit_bytes=vmem_limit,
        ),
        cost_estimate=pl.CostEstimate(
            flops=flops, transcendentals=0, bytes_accessed=bytes_accessed,
        ),
    )(scale, x_t,
      prepared["w1"], prepared["b1"],
      prepared["w2"], prepared["b2"],
      prepared["w3"], prepared["b3"])

    # Strip the (tiny, 8-row) output padding and return batch-major [B, num_output].
    return out_t[:num_output, :B].T


def ratio_estimator_ref(x, p, scale=1.0):
    h1 = jnp.maximum(x @ p["w1"].T + p["b1"], 0.0)
    h2 = jnp.maximum(h1 @ p["w2"].T + p["b2"], 0.0)
    return scale * (h2 @ p["w3"].T + p["b3"])


if __name__ == "__main__":
    # Small shapes consistent with the module: batch=8, num_input=4, hidden=32, output=2.
    B, NUM_INPUT, NUM_HIDDEN, NUM_OUTPUT = 8, 4, 32, 2

    key = jax.random.PRNGKey(0)
    kx, kp = jax.random.split(key)
    x = jax.random.normal(kx, (B, NUM_INPUT), dtype=jnp.float32)
    params = init_params(kp, NUM_INPUT, NUM_HIDDEN, NUM_OUTPUT)
    prepared = prepare_params(params)   # one-time pad/cast (hoisted out of the forward)

    out = jax.block_until_ready(ratio_estimator_forward(x, prepared, output_scale=1.0))
    ref = ratio_estimator_ref(x, params, 1.0)
    assert out.shape == (B, NUM_OUTPUT)
    # bf16 matmul inputs with f32 accumulation vs f32 reference -> modest tolerance
    assert jnp.allclose(out, ref, atol=3e-2, rtol=3e-2), float(jnp.max(jnp.abs(out - ref)))

    # Second check: multi-tile batch grid + non-unit runtime scale (no recompile for scale).
    B2, SCALE2 = 300, 2.5
    x2 = jax.random.normal(jax.random.PRNGKey(1), (B2, NUM_INPUT), dtype=jnp.float32)
    out2 = jax.block_until_ready(ratio_estimator_forward(x2, prepared, output_scale=SCALE2))
    ref2 = ratio_estimator_ref(x2, params, SCALE2)
    assert out2.shape == (B2, NUM_OUTPUT)
    assert jnp.allclose(out2, ref2, atol=3e-2, rtol=3e-2), float(jnp.max(jnp.abs(out2 - ref2)))

    print("KERNEL_OK")
</pallas_src>

<mosaic_0001>
module attributes {stable_mosaic.version = 11 : i64} {
  func.func @_mlp_kernel(%arg0: i32, %arg1: memref<1x1xf32, #tpu.memory_space<smem>>, %arg2: memref<8x128xbf16, #tpu.memory_space<vmem>>, %arg3: memref<128x8xbf16, #tpu.memory_space<vmem>>, %arg4: memref<128x1xf32, #tpu.memory_space<vmem>>, %arg5: memref<128x128xbf16, #tpu.memory_space<vmem>>, %arg6: memref<128x1xf32, #tpu.memory_space<vmem>>, %arg7: memref<8x128xbf16, #tpu.memory_space<vmem>>, %arg8: memref<8x1xf32, #tpu.memory_space<vmem>>, %arg9: memref<8x128xf32, #tpu.memory_space<vmem>>) attributes {dimension_semantics = [#tpu.dimension_semantics<parallel>], iteration_bounds = array<i64: 1>, scalar_prefetch = 0 : i64, scratch_operands = 0 : i64, tpu.core_type = #tpu.core_type<tc>, window_params = [{transform_indices = @transform_0, window_bounds = array<i64: 1, 1>}, {transform_indices = @transform_1, window_bounds = array<i64: 8, 128>}, {pipeline_mode = #tpu.pipeline_mode<synchronous>, transform_indices = @transform_2, window_bounds = array<i64: 128, 8>}, {pipeline_mode = #tpu.pipeline_mode<synchronous>, transform_indices = @transform_3, window_bounds = array<i64: 128, 1>}, {pipeline_mode = #tpu.pipeline_mode<synchronous>, transform_indices = @transform_4, window_bounds = array<i64: 128, 128>}, {pipeline_mode = #tpu.pipeline_mode<synchronous>, transform_indices = @transform_5, window_bounds = array<i64: 128, 1>}, {pipeline_mode = #tpu.pipeline_mode<synchronous>, transform_indices = @transform_6, window_bounds = array<i64: 8, 128>}, {pipeline_mode = #tpu.pipeline_mode<synchronous>, transform_indices = @transform_7, window_bounds = array<i64: 8, 1>}, {transform_indices = @transform_8, window_bounds = array<i64: 8, 128>}]} {
    %c0 = arith.constant 0 : index
    %c0_0 = arith.constant 0 : index
    %0 = vector.load %arg3[%c0, %c0_0] : memref<128x8xbf16, #tpu.memory_space<vmem>>, vector<128x8xbf16>
    %c0_1 = arith.constant 0 : index
    %c0_2 = arith.constant 0 : index
    %1 = vector.load %arg2[%c0_1, %c0_2] : memref<8x128xbf16, #tpu.memory_space<vmem>>, vector<8x128xbf16>
    %cst = arith.constant dense<0.000000e+00> : vector<128x128xf32>
    %2 = tpu.matmul %0, %1, %cst {dimension_numbers = #tpu.dot_dimension_numbers<[1], [0], [0], [1], [0, 0, 1, 1], [], []>} : vector<128x8xbf16>, vector<8x128xbf16>, vector<128x128xf32> -> vector<128x128xf32>
    %c0_3 = arith.constant 0 : index
    %c0_4 = arith.constant 0 : index
    %3 = vector.load %arg4[%c0_3, %c0_4] : memref<128x1xf32, #tpu.memory_space<vmem>>, vector<128x1xf32>
    %4 = vector.broadcast %3 : vector<128x1xf32> to vector<128x128xf32>
    %5 = arith.addf %2, %4 : vector<128x128xf32>
    %cst_5 = arith.constant 0.000000e+00 : f32
    %6 = vector.broadcast %cst_5 : f32 to vector<128x128xf32>
    %7 = arith.maximumf %5, %6 : vector<128x128xf32>
    %8 = arith.truncf %7 : vector<128x128xf32> to vector<128x128xbf16>
    %c0_6 = arith.constant 0 : index
    %c0_7 = arith.constant 0 : index
    %9 = vector.load %arg5[%c0_6, %c0_7] : memref<128x128xbf16, #tpu.memory_space<vmem>>, vector<128x128xbf16>
    %cst_8 = arith.constant dense<0.000000e+00> : vector<128x128xf32>
    %10 = tpu.matmul %9, %8, %cst_8 {dimension_numbers = #tpu.dot_dimension_numbers<[1], [0], [0], [1], [0, 0, 1, 1], [], []>} : vector<128x128xbf16>, vector<128x128xbf16>, vector<128x128xf32> -> vector<128x128xf32>
    %c0_9 = arith.constant 0 : index
    %c0_10 = arith.constant 0 : index
    %11 = vector.load %arg6[%c0_9, %c0_10] : memref<128x1xf32, #tpu.memory_space<vmem>>, vector<128x1xf32>
    %12 = vector.broadcast %11 : vector<128x1xf32> to vector<128x128xf32>
    %13 = arith.addf %10, %12 : vector<128x128xf32>
    %cst_11 = arith.constant 0.000000e+00 : f32
    %14 = vector.broadcast %cst_11 : f32 to vector<128x128xf32>
    %15 = arith.maximumf %13, %14 : vector<128x128xf32>
    %16 = arith.truncf %15 : vector<128x128xf32> to vector<128x128xbf16>
    %c0_12 = arith.constant 0 : index
    %c0_13 = arith.constant 0 : index
    %17 = vector.load %arg7[%c0_12, %c0_13] : memref<8x128xbf16, #tpu.memory_space<vmem>>, vector<8x128xbf16>
    %cst_14 = arith.constant dense<0.000000e+00> : vector<8x128xf32>
    %18 = tpu.matmul %17, %16, %cst_14 {dimension_numbers = #tpu.dot_dimension_numbers<[1], [0], [0], [1], [0, 0, 1, 1], [], []>} : vector<8x128xbf16>, vector<128x128xbf16>, vector<8x128xf32> -> vector<8x128xf32>
    %c0_15 = arith.constant 0 : index
    %c0_16 = arith.constant 0 : index
    %19 = vector.load %arg8[%c0_15, %c0_16] : memref<8x1xf32, #tpu.memory_space<vmem>>, vector<8x1xf32>
    %20 = vector.broadcast %19 : vector<8x1xf32> to vector<8x128xf32>
    %21 = arith.addf %18, %20 : vector<8x128xf32>
    %c0_17 = arith.constant 0 : index
    %c0_18 = arith.constant 0 : index
    %22 = memref.load %arg1[%c0_17, %c0_18] : memref<1x1xf32, #tpu.memory_space<smem>>
    %23 = vector.broadcast %22 : f32 to vector<8x128xf32>
    %24 = arith.mulf %21, %23 : vector<8x128xf32>
    %c0_19 = arith.constant 0 : index
    %c0_20 = arith.constant 0 : index
    %25 = vector.load %arg9[%c0_19, %c0_20] : memref<8x128xf32, #tpu.memory_space<vmem>>, vector<8x128xf32>
    tpu.vector_store %arg9[%c0_19, %c0_20], %24 {strides = array<i32>} : memref<8x128xf32, #tpu.memory_space<vmem>>, vector<8x128xf32>,
    return
  }
  func.func @transform_0(%arg0: i32) -> (i32, i32) {
    %c0_i32 = arith.constant 0 : i32
    %c0_i32_0 = arith.constant 0 : i32
    %c0_i32_1 = arith.constant 0 : i32
    return %c0_i32, %c0_i32_0 : i32, i32
  }
  func.func @transform_1(%arg0: i32) -> (i32, i32) {
    %c0_i32 = arith.constant 0 : i32
    %c0_i32_0 = arith.constant 0 : i32
    return %c0_i32, %arg0 : i32, i32
  }
  func.func @transform_2(%arg0: i32) -> (i32, i32) {
    %c0_i32 = arith.constant 0 : i32
    %c0_i32_0 = arith.constant 0 : i32
    %c0_i32_1 = arith.constant 0 : i32
    return %c0_i32, %c0_i32_0 : i32, i32
  }
  func.func @transform_3(%arg0: i32) -> (i32, i32) {
    %c0_i32 = arith.constant 0 : i32
    %c0_i32_0 = arith.constant 0 : i32
    %c0_i32_1 = arith.constant 0 : i32
    return %c0_i32, %c0_i32_0 : i32, i32
  }
  func.func @transform_4(%arg0: i32) -> (i32, i32) {
    %c0_i32 = arith.constant 0 : i32
    %c0_i32_0 = arith.constant 0 : i32
    %c0_i32_1 = arith.constant 0 : i32
    return %c0_i32, %c0_i32_0 : i32, i32
  }
  func.func @transform_5(%arg0: i32) -> (i32, i32) {
    %c0_i32 = arith.constant 0 : i32
    %c0_i32_0 = arith.constant 0 : i32
    %c0_i32_1 = arith.constant 0 : i32
    return %c0_i32, %c0_i32_0 : i32, i32
  }
  func.func @transform_6(%arg0: i32) -> (i32, i32) {
    %c0_i32 = arith.constant 0 : i32
    %c0_i32_0 = arith.constant 0 : i32
    %c0_i32_1 = arith.constant 0 : i32
    return %c0_i32, %c0_i32_0 : i32, i32
  }
  func.func @transform_7(%arg0: i32) -> (i32, i32) {
    %c0_i32 = arith.constant 0 : i32
    %c0_i32_0 = arith.constant 0 : i32
    %c0_i32_1 = arith.constant 0 : i32
    return %c0_i32, %c0_i32_0 : i32, i32
  }
  func.func @transform_8(%arg0: i32) -> (i32, i32) {
    %c0_i32 = arith.constant 0 : i32
    %c0_i32_0 = arith.constant 0 : i32
    return %c0_i32, %arg0 : i32, i32
  }
}

</mosaic_0001>

<bundles_post_ra>
// kernel: tpu_custom_call.1
= control target key start
LH: loop header
LB: loop body
LE: loop exit
PB: predicated region body
PF: predicated region fallthrough
CT: control target
= control target key end

     0   :  { %vm210_vm0 = vcmask 1043456   ;;  %vm185_vm1 = vcmask 64512   ;;  %v856_v5 = vmov 0   ;;  %s1090_s0 = inlined_call_operand.<no memory space> [shape: f32[1,1], index: 0, kind: input, shape index: {}]   ;;  %s1091_s1 = inlined_call_operand.vmem [shape: bf16[8,128], index: 1, kind: input, shape index: {}]   ;;  %s1092_s2 = inlined_call_operand.vmem [shape: bf16[128,8], index: 2, kind: input, shape index: {}]   ;;  %s1093_s3 = inlined_call_operand.vmem [shape: f32[128,1], index: 3, kind: input, shape index: {}]   ;;  %s1094_s4 = inlined_call_operand.vmem [shape: bf16[128,128], index: 4, kind: input, shape index: {}]   ;;  %s1095_s5 = inlined_call_operand.vmem [shape: f32[128,1], index: 5, kind: input, shape index: {}]   ;;  %s1096_s6 = inlined_call_operand.vmem [shape: bf16[8,128], index: 6, kind: input, shape index: {}]   ;;  %s1097_s7 = inlined_call_operand.vmem [shape: f32[8,1], index: 7, kind: input, shape index: {}]   ;;  %s1098_s8 = inlined_call_operand.hbm [shape: f32[8,128], index: 8, kind: output, shape index: {}]  }
   0x1   :  { %v48_v0 = vld [vmem:[%s1091_s1] sm:$0xf]  ;;  %v817_v3 = vld [vmem:[%s1092_s2 + $0x8] sm:$0xff]   ;;  %v818_v4 = vld [vmem:[%s1092_s2 + $0x10] sm:$0xff]   ;;  %814 = vset.pattern.permute.xlu0 %v856_v5  ;;  %815 = vset.pattern.permute.xlu1 %v856_v5 }
   0x2   :  { %v816_v1 = vld [vmem:[%s1092_s2] sm:$0xff]   ;;  %809 = vmatprep.subr.msk.bf16.mxu0 %vm210_vm0, %v48_v0  ;;  %v212_v2 = vsel %vm210_vm0, %v48_v0, 0  ;;  %v50_v7 = vld [vmem:[%s1093_s3 + $0x8] sm:$0xff]  ;;  %v819_v8 = vld [vmem:[%s1092_s2 + $0x18] sm:$0xff]  }
   0x3   :  { %740 = vmatpush3.bf16.msra.mxu0 %v212_v2  ;;  %741 = vmatprep.mubr.msk.bf16.mxu0 %vm185_vm1, %v816_v1  ;;  %v49_v6 = vld [vmem:[%s1093_s3] sm:$0xff]  ;;  %v51_v9 = vld [vmem:[%s1093_s3 + $0x10] sm:$0xff]  ;;  %v52_v11 = vld [vmem:[%s1093_s3 + $0x18] sm:$0xff] }
   0x4   :  { %67 = vperm.xlu0 %814, %v49_v6   ;;  %v820_v10 = vld [vmem:[%s1092_s2 + $0x20] sm:$0xff]   ;;  %77 = vperm.xlu1 %815, %v51_v9   ;;  %v54_v13 = vld [vmem:[%s1093_s3 + $0x28] sm:$0xff]  ;;  %v55_v14 = vld [vmem:[%s1093_s3 + $0x30] sm:$0xff] }
   0x5   :  { %v53_v12 = vld [vmem:[%s1093_s3 + $0x20] sm:$0xff]  ;;  %v821_v15 = vld [vmem:[%s1092_s2 + $0x28] sm:$0xff]   ;;  %v822_v16 = vld [vmem:[%s1092_s2 + $0x30] sm:$0xff]  }
   0x6   :  { %742 = vmatmul.mubr.msk.bf16.vlgmr.msra.gmra.mrb[0].mxu0 %vm185_vm1, %v817_v3  ;;  %v57_v17 = vld [vmem:[%s1093_s3 + $0x40] sm:$0xff]  ;;  %v56_v18 = vld [vmem:[%s1093_s3 + $0x38] sm:$0xff]  ;;  %v58_v19 = vld [vmem:[%s1093_s3 + $0x48] sm:$0xff] }
   0x7   :  { %745 = vmatprep.mubr.msk.bf16.mxu0 %vm185_vm1, %v818_v4  ;;  %v59_v20 = vld [vmem:[%s1093_s3 + $0x50] sm:$0xff]  ;;  %v823_v21 = vld [vmem:[%s1092_s2 + $0x38] sm:$0xff]  }
   0x8   :  { %72 = vperm.xlu0 %814, %v50_v7   ;;  %82 = vperm.xlu1 %815, %v52_v11  }
   0xc   :  { %87 = vperm.xlu0 %814, %v53_v12   ;;  %92 = vperm.xlu1 %815, %v54_v13  }
   0xe   :  { %746 = vmatmul.mubr.msk.bf16.gmra.mrb[4].mxu0 %vm185_vm1, %v819_v8 }
   0xf   :  { %749 = vmatprep.mubr.msk.bf16.mxu0 %vm185_vm1, %v820_v10 }
  0x10   :  { %97 = vperm.xlu0 %814, %v55_v14   ;;  %102 = vperm.xlu1 %815, %v56_v18  }
  0x14   :  { %107 = vperm.xlu0 %814, %v57_v17  }
  0x16   :  { %750 = vmatmul.mubr.msk.bf16.gmra.mrb[8].mxu0 %vm185_vm1, %v821_v15 }
  0x17   :  { %753 = vmatprep.mubr.msk.bf16.mxu0 %vm185_vm1, %v822_v16 }
  0x18   :  { %14 = vsyncpa [#allocation4], 0  ;;  %112 = vperm.xlu1 %815, %v58_v19   ;;  %117 = vperm.xlu0 %814, %v59_v20   ;;  %v60_v22 = vld [vmem:[%s1093_s3 + $0x58] sm:$0xff]  ;;  %v61_v23 = vld [vmem:[%s1093_s3 + $0x60] sm:$0xff]  ;;  %vm858_vm2 = vmmov 0   ;;  %s859_s9 = smov [#allocation3]  }
  0x19   :  { %v62_v24 = vld [vmem:[%s1093_s3 + $0x68] sm:$0xff]  ;;  %v63_v25 = vld [vmem:[%s1093_s3 + $0x70] sm:$0xff]  ;;  %v64_v26 = vld [vmem:[%s1093_s3 + $0x78] sm:$0xff]  ;;  %s673_s10 = sshll.u32 %s859_s9, 4  ;;  %s674_s10 = int_to_ptr.vmem [resolvable:$true] %s673_s10 }
  0x1a   :  { %v351_v27 = vld [vmem:[%s1095_s5] sm:$0xff]  ;;  %v352_v28 = vld [vmem:[%s1095_s5 + $0x8] sm:$0xff]  ;;  %v353_v29 = vld [vmem:[%s1095_s5 + $0x10] sm:$0xff]  ;;  %s832_s11 = scalar_lea.vmem %s674_s10, 128  ;;  %p837_p1 = scmp.lt.s32.totalorder %s674_s10, %s674_s10 }
  0x1b   :  { %v354_v30 = vld [vmem:[%s1095_s5 + $0x18] sm:$0xff]  ;;  %v355_v31 = vld [vmem:[%s1095_s5 + $0x20] sm:$0xff]  ;;  %v356_v32 = vld [vmem:[%s1095_s5 + $0x28] sm:$0xff]  ;;  %p833_p0 = scmp.ne.s32.totalorder %s674_s10, %s832_s11  ;;  %p838_p2 = scmp.lt.s32.totalorder %s832_s11, %s832_s11 }
  0x1c   :  { %122 = vperm.xlu1 %815, %v60_v22   ;;  %127 = vperm.xlu0 %814, %v61_v23   ;;  %v357_v33 = vld [vmem:[%s1095_s5 + $0x30] sm:$0xff]  ;;  %v358_v34 = vld [vmem:[%s1095_s5 + $0x38] sm:$0xff]  ;;  %v359_v35 = vld [vmem:[%s1095_s5 + $0x40] sm:$0xff] }
  0x1d   :  { %v360_v36 = vld [vmem:[%s1095_s5 + $0x48] sm:$0xff]  ;;  %v361_v37 = vld [vmem:[%s1095_s5 + $0x50] sm:$0xff]  ;;  %v362_v38 = vld [vmem:[%s1095_s5 + $0x58] sm:$0xff]  ;;  %p839_p3 = por %p838_p2, %p837_p1 }
  0x1e   :  { %754 = vmatmul.mubr.msk.bf16.gmra.mrb[12].mxu0 %vm185_vm1, %v823_v21  ;;  %v363_v39 = vld [vmem:[%s1095_s5 + $0x60] sm:$0xff]  ;;  %v364_v40 = vld [vmem:[%s1095_s5 + $0x68] sm:$0xff]  ;;  %v365_v41 = vld [vmem:[%s1095_s5 + $0x70] sm:$0xff] }
  0x1f   :  { %v366_v42 = vld [vmem:[%s1095_s5 + $0x78] sm:$0xff]  ;;  %v617_v43 = vld [vmem:[%s1097_s7] sm:$0xff]  ;;  %p840_p4 = pnand %p839_p3, %p833_p0 }
  0x20   :  { %132 = vperm.xlu1 %815, %v62_v24   ;;  %137 = vperm.xlu0 %814, %v63_v25   ;;  %v824_v44 = vld [vmem:[%s1094_s4] sm:$0xff]  }
  0x21   :  { %773 = vmatprep.mubr.bf16.mxu1 %v824_v44 }
  0x24   :  { %142 = vperm.xlu1 %815, %v64_v26   ;;  %369 = vperm.xlu0 %814, %v351_v27  }
  0x28   :  { %374 = vperm.xlu1 %815, %v352_v28   ;;  %379 = vperm.xlu0 %814, %v353_v29  }
  0x2c   :  { %384 = vperm.xlu1 %815, %v354_v30   ;;  %389 = vperm.xlu0 %814, %v355_v31  }
  0x30   :  { %394 = vperm.xlu1 %815, %v356_v32   ;;  %399 = vperm.xlu0 %814, %v357_v33  }
  0x34   :  { %404 = vperm.xlu1 %815, %v358_v34   ;;  %409 = vperm.xlu0 %814, %v359_v35  }
  0x38   :  { %414 = vperm.xlu1 %815, %v360_v36   ;;  %419 = vperm.xlu0 %814, %v361_v37  }
  0x3c   :  { %424 = vperm.xlu1 %815, %v362_v38   ;;  %429 = vperm.xlu0 %814, %v363_v39  }
  0x40   :  { %434 = vperm.xlu1 %815, %v364_v40   ;;  %439 = vperm.xlu0 %814, %v365_v41  }
  0x44   :  { %444 = vperm.xlu1 %815, %v366_v42   ;;  %620 = vperm.xlu0 %814, %v617_v43  }
  0x83   :  { %v68_v45 = vpop.permute.xlu0 %67  ;;  %v78_v46 = vpop.permute.xlu1 %77 }
  0x87   :  { %v73_v47 = vpop.permute.xlu0 %72  ;;  %v83_v48 = vpop.permute.xlu1 %82 }
  0x8b   :  { %v88_v49 = vpop.permute.xlu0 %87  ;;  %v93_v50 = vpop.permute.xlu1 %92 }
  0x8f   :  { %v98_v51 = vpop.permute.xlu0 %97  ;;  %v103_v55 = vpop.permute.xlu1 %102 }
  0x93   :  { %v108_v63 = vpop.permute.xlu0 %107 }
  0x97   :  { %v113_v3 = vpop.permute.xlu1 %112  ;;  %v118_v12 = vpop.permute.xlu0 %117 }
  0x9b   :  { %v123_v16 = vpop.permute.xlu1 %122  ;;  %v128_v24 = vpop.permute.xlu0 %127 }
  0x9f   :  { %v133_v29 = vpop.permute.xlu1 %132  ;;  %v138_v36 = vpop.permute.xlu0 %137 }
  0xa3   :  { %v143_v41 = vpop.permute.xlu1 %142 }
  0xd9   :  { %v743_v52 = vpop.f32.mrb[0].mxu0 }
  0xda   :  { %v257_v53 = vadd.f32 %v743_v52, %v78_v46  ;;  %v248_v54 = vpop.f32.mrb[1].mxu0 }
  0xdb   :  { %v249_v56 = vadd.f32 %v248_v54, %v68_v45  ;;  %v744_v57 = vpop.f32.mrb[2].mxu0  ;;  %v826_v54 = vld [vmem:[%s1094_s4 + $0x10] sm:$0xff]  }
  0xdc   :  { %v260_v58 = vadd.f32 %v744_v57, %v83_v48  ;;  %v251_v59 = vpop.f32.mrb[3].mxu0  ;;  %v313_v61 = vmax.f32 %v257_v53, 0.0  ;;  %v825_v53 = vld [vmem:[%s1094_s4 + $0x8] sm:$0xff]  }
  0xdd   :  { %v252_v60 = vadd.f32 %v251_v59, %v73_v47  ;;  %v311_v0 = vmax.f32 %v249_v56, 0.0  ;;  %v828_v56 = vld [vmem:[%s1094_s4 + $0x20] sm:$0xff]   ;;  %v829_v57 = vld [vmem:[%s1094_s4 + $0x28] sm:$0xff]   ;;  %v831_v59 = vld [vmem:[%s1094_s4 + $0x38] sm:$0xff]  }
  0xde   :  { %v314_v62 = vmax.f32 %v260_v58, 0.0  ;;  %v830_v58 = vld [vmem:[%s1094_s4 + $0x30] sm:$0xff]  }
  0xdf   :  { %v312_v1 = vmax.f32 %v252_v60, 0.0  ;;  %v857_v60 = vmov 0.0  }
  0xe0   :  { %v328_v2 = vpack.c.bf16 %v314_v62, %v313_v61  ;;  %789 = vmatprep.subr.bf16.mxu0 %v857_v60  ;;  %805 = vmatprep.mubr.msk.bf16.mxu0 %vm858_vm2, %v857_v60  ;;  %v370_v61 = vpop.permute.xlu0 %369  ;;  %v375_v62 = vpop.permute.xlu1 %374 }
  0xe1   :  { %v747_v4 = vpop.f32.mrb[4].mxu0  ;;  %v327_v5 = vpack.c.bf16 %v312_v1, %v311_v0 }
  0xe2   :  { %v273_v6 = vadd.f32 %v747_v4, %v98_v51  ;;  %v264_v7 = vpop.f32.mrb[5].mxu0 }
  0xe3   :  { %v265_v8 = vadd.f32 %v264_v7, %v88_v49  ;;  %v748_v9 = vpop.f32.mrb[6].mxu0  ;;  %757 = vmatprep.subr.bf16.mxu1 %v327_v5 }
  0xe4   :  { %v276_v10 = vadd.f32 %v748_v9, %v103_v55  ;;  %v267_v11 = vpop.f32.mrb[7].mxu0  ;;  %758 = vmatpush3.bf16.msra.mxu1 %v327_v5  ;;  %v317_v14 = vmax.f32 %v273_v6, 0.0  ;;  %v827_v55 = vld [vmem:[%s1094_s4 + $0x18] sm:$0xff]   ;;  %v385_v0 = vpop.permute.xlu1 %384 }
  0xe5   :  { %v268_v13 = vadd.f32 %v267_v11, %v93_v50  ;;  %759 = vmatprep.subr.bf16.mxu1 %v328_v2  ;;  %v315_v17 = vmax.f32 %v265_v8, 0.0 }
  0xe6   :  { %v318_v15 = vmax.f32 %v276_v10, 0.0 }
  0xe7   :  { %v316_v18 = vmax.f32 %v268_v13, 0.0 }
  0xe8   :  { %v330_v19 = vpack.c.bf16 %v318_v15, %v317_v14  ;;  %760 = vmatpush3.bf16.msra.mxu1 %v328_v2  ;;  %v395_v2 = vpop.permute.xlu1 %394 }
  0xe9   :  { %v329_v20 = vpack.c.bf16 %v316_v18, %v315_v17  ;;  %v751_v21 = vpop.f32.mrb[8].mxu0 }
  0xea   :  { %v289_v22 = vadd.f32 %v751_v21, %v118_v12  ;;  %v280_v23 = vpop.f32.mrb[9].mxu0 }
  0xeb   :  { %v281_v25 = vadd.f32 %v280_v23, %v108_v63  ;;  %v752_v26 = vpop.f32.mrb[10].mxu0  ;;  %761 = vmatprep.subr.bf16.mxu1 %v329_v20  ;;  %v380_v63 = vpop.permute.xlu0 %379 }
  0xec   :  { %v292_v27 = vadd.f32 %v752_v26, %v123_v16  ;;  %v283_v28 = vpop.f32.mrb[11].mxu0  ;;  %762 = vmatpush3.bf16.msra.mxu1 %v329_v20  ;;  %v321_v31 = vmax.f32 %v289_v22, 0.0  ;;  %v405_v7 = vpop.permute.xlu1 %404 }
  0xed   :  { %v284_v30 = vadd.f32 %v283_v28, %v113_v3  ;;  %763 = vmatprep.subr.bf16.mxu1 %v330_v19  ;;  %v319_v33 = vmax.f32 %v281_v25, 0.0 }
  0xee   :  { %v322_v32 = vmax.f32 %v292_v27, 0.0 }
  0xef   :  { %v320_v34 = vmax.f32 %v284_v30, 0.0  ;;  %v390_v1 = vpop.permute.xlu0 %389 }
  0xf0   :  { %v332_v35 = vpack.c.bf16 %v322_v32, %v321_v31  ;;  %764 = vmatpush3.bf16.msra.mxu1 %v330_v19  ;;  %v415_v19 = vpop.permute.xlu1 %414 }
  0xf1   :  { %v331_v37 = vpack.c.bf16 %v320_v34, %v319_v33  ;;  %v755_v38 = vpop.f32.mrb[12].mxu0 }
  0xf2   :  { %v305_v39 = vadd.f32 %v755_v38, %v138_v36  ;;  %v296_v40 = vpop.f32.mrb[13].mxu0 }
  0xf3   :  { %v297_v42 = vadd.f32 %v296_v40, %v128_v24  ;;  %v756_v43 = vpop.f32.mrb[14].mxu0  ;;  %765 = vmatprep.subr.bf16.mxu1 %v331_v37  ;;  %v400_v3 = vpop.permute.xlu0 %399 }
  0xf4   :  { %v308_v44 = vadd.f32 %v756_v43, %v143_v41  ;;  %v299_v45 = vpop.f32.mrb[15].mxu0  ;;  %766 = vmatpush3.bf16.msra.mxu1 %v331_v37  ;;  %v325_v47 = vmax.f32 %v305_v39, 0.0  ;;  %v425_v32 = vpop.permute.xlu1 %424 }
  0xf5   :  { %v300_v46 = vadd.f32 %v299_v45, %v133_v29  ;;  %767 = vmatprep.subr.bf16.mxu1 %v332_v35  ;;  %v323_v49 = vmax.f32 %v297_v42, 0.0 }
  0xf6   :  { %v326_v48 = vmax.f32 %v308_v44, 0.0 }
  0xf7   :  { %v324_v50 = vmax.f32 %v300_v46, 0.0  ;;  %v410_v15 = vpop.permute.xlu0 %409 }
  0xf8   :  { %v334_v51 = vpack.c.bf16 %v326_v48, %v325_v47  ;;  %768 = vmatpush3.bf16.msra.mxu1 %v332_v35  ;;  %v435_v45 = vpop.permute.xlu1 %434 }
  0xf9   :  { %v333_v52 = vpack.c.bf16 %v324_v50, %v323_v49 }
  0xfb   :  { %769 = vmatprep.subr.bf16.mxu1 %v333_v52  ;;  %v420_v28 = vpop.permute.xlu0 %419 }
  0xfc   :  { %770 = vmatpush3.bf16.msra.mxu1 %v333_v52 }
  0xfd   :  { %771 = vmatprep.subr.bf16.mxu1 %v334_v51 }
  0xff   :  { %v430_v40 = vpop.permute.xlu0 %429 }
 0x100   :  { %772 = vmatpush3.bf16.msra.mxu1 %v334_v51 }
 0x103   :  { %774 = vmatmul.mubr.bf16.vlgmr.msra.gmra.mrb[0].mxu1 %v825_v53  ;;  %v440_v52 = vpop.permute.xlu0 %439 }
 0x104   :  { %777 = vmatprep.mubr.bf16.mxu1 %v826_v54 }
 0x10b   :  { %778 = vmatmul.mubr.bf16.gmra.mrb[4].mxu1 %v827_v55 }
 0x10c   :  { %781 = vmatprep.mubr.bf16.mxu1 %v828_v56 }
 0x113   :  { %782 = vmatmul.mubr.bf16.gmra.mrb[8].mxu1 %v829_v57  ;;  %v445_v57 = vpop.permute.xlu1 %444 }
 0x114   :  { %785 = vmatprep.mubr.bf16.mxu1 %v830_v58 }
 0x11b   :  { %786 = vmatmul.mubr.bf16.gmra.mrb[12].mxu1 %v831_v59 }
 0x1d6   :  { %v775_v4 = vpop.f32.mrb[0].mxu1 }
 0x1d7   :  { %v538_v5 = vadd.f32 %v775_v4, %v380_v63  ;;  %v529_v6 = vpop.f32.mrb[1].mxu1 }
 0x1d8   :  { %v530_v8 = vadd.f32 %v529_v6, %v370_v61  ;;  %v776_v9 = vpop.f32.mrb[2].mxu1  ;;  %v616_v6 = vld [vmem:[%s1096_s6] sm:$0xf] }
 0x1d9   :  { %v541_v10 = vadd.f32 %v776_v9, %v385_v0  ;;  %v532_v11 = vpop.f32.mrb[3].mxu1  ;;  %v594_v13 = vmax.f32 %v538_v5, 0.0  ;;  %v664_v9 = vstv %s1090_s0 }
 0x1da   :  { %v533_v12 = vadd.f32 %v532_v11, %v375_v62  ;;  %v592_v16 = vmax.f32 %v530_v8, 0.0 }
 0x1db   :  { %v595_v14 = vmax.f32 %v541_v10, 0.0 }
 0x1dc   :  { %v593_v17 = vmax.f32 %v533_v12, 0.0 }
 0x1dd   :  { %v609_v18 = vpack.c.bf16 %v595_v14, %v594_v13 }
 0x1de   :  { %v608_v20 = vpack.c.bf16 %v593_v17, %v592_v16  ;;  %v779_v21 = vpop.f32.mrb[4].mxu1 }
 0x1df   :  { %v554_v22 = vadd.f32 %v779_v21, %v400_v3  ;;  %v545_v23 = vpop.f32.mrb[5].mxu1 }
 0x1e0   :  { %v546_v24 = vadd.f32 %v545_v23, %v390_v1  ;;  %v780_v25 = vpop.f32.mrb[6].mxu1  ;;  %790 = vmatpush3.bf16.msra.mxu0 %v608_v20 }
 0x1e1   :  { %v557_v26 = vadd.f32 %v780_v25, %v405_v7  ;;  %v548_v27 = vpop.f32.mrb[7].mxu1  ;;  %791 = vmatprep.subr.bf16.mxu0 %v857_v60  ;;  %v598_v30 = vmax.f32 %v554_v22, 0.0  ;;  %v621_v7 = vpop.permute.xlu0 %620 }
 0x1e2   :  { %v549_v29 = vadd.f32 %v548_v27, %v395_v2  ;;  %v596_v33 = vmax.f32 %v546_v24, 0.0 }
 0x1e3   :  { %v599_v31 = vmax.f32 %v557_v26, 0.0 }
 0x1e4   :  { %v597_v34 = vmax.f32 %v549_v29, 0.0  ;;  %792 = vmatpush3.bf16.msra.mxu0 %v609_v18 }
 0x1e5   :  { %v611_v35 = vpack.c.bf16 %v599_v31, %v598_v30  ;;  %793 = vmatprep.subr.bf16.mxu0 %v857_v60 }
 0x1e6   :  { %v610_v36 = vpack.c.bf16 %v597_v34, %v596_v33  ;;  %v783_v37 = vpop.f32.mrb[8].mxu1 }
 0x1e7   :  { %v570_v38 = vadd.f32 %v783_v37, %v420_v28  ;;  %v561_v39 = vpop.f32.mrb[9].mxu1 }
 0x1e8   :  { %v562_v41 = vadd.f32 %v561_v39, %v410_v15  ;;  %v784_v42 = vpop.f32.mrb[10].mxu1  ;;  %794 = vmatpush3.bf16.msra.mxu0 %v610_v36 }
 0x1e9   :  { %v573_v43 = vadd.f32 %v784_v42, %v425_v32  ;;  %v564_v44 = vpop.f32.mrb[11].mxu1  ;;  %795 = vmatprep.subr.bf16.mxu0 %v857_v60  ;;  %v602_v47 = vmax.f32 %v570_v38, 0.0 }
 0x1ea   :  { %v565_v46 = vadd.f32 %v564_v44, %v415_v19  ;;  %v600_v49 = vmax.f32 %v562_v41, 0.0 }
 0x1eb   :  { %v603_v48 = vmax.f32 %v573_v43, 0.0 }
 0x1ec   :  { %v601_v50 = vmax.f32 %v565_v46, 0.0  ;;  %796 = vmatpush3.bf16.msra.mxu0 %v611_v35 }
 0x1ed   :  { %v613_v51 = vpack.c.bf16 %v603_v48, %v602_v47  ;;  %797 = vmatprep.subr.bf16.mxu0 %v857_v60 }
 0x1ee   :  { %v612_v53 = vpack.c.bf16 %v601_v50, %v600_v49  ;;  %v787_v54 = vpop.f32.mrb[12].mxu1 }
 0x1ef   :  { %v586_v55 = vadd.f32 %v787_v54, %v440_v52  ;;  %v577_v56 = vpop.f32.mrb[13].mxu1 }
 0x1f0   :  { %v578_v58 = vadd.f32 %v577_v56, %v430_v40  ;;  %v788_v59 = vpop.f32.mrb[14].mxu1  ;;  %798 = vmatpush3.bf16.msra.mxu0 %v612_v53 }
 0x1f1   :  { %v589_v61 = vadd.f32 %v788_v59, %v445_v57  ;;  %v580_v62 = vpop.f32.mrb[15].mxu1  ;;  %799 = vmatprep.subr.bf16.mxu0 %v857_v60  ;;  %v606_v0 = vmax.f32 %v586_v55, 0.0 }
 0x1f2   :  { %v581_v63 = vadd.f32 %v580_v62, %v435_v45  ;;  %v604_v2 = vmax.f32 %v578_v58, 0.0 }
 0x1f3   :  { %v607_v1 = vmax.f32 %v589_v61, 0.0 }
 0x1f4   :  { %v605_v3 = vmax.f32 %v581_v63, 0.0  ;;  %800 = vmatpush3.bf16.msra.mxu0 %v613_v51 }
 0x1f5   :  { %v615_v4 = vpack.c.bf16 %v607_v1, %v606_v0  ;;  %801 = vmatprep.subr.bf16.mxu0 %v857_v60 }
 0x1f6   :  { %v614_v5 = vpack.c.bf16 %v605_v3, %v604_v2 }
 0x1f8   :  { %802 = vmatpush3.bf16.msra.mxu0 %v614_v5 }
 0x1f9   :  { %803 = vmatprep.subr.bf16.mxu0 %v857_v60 }
 0x1fc   :  { %804 = vmatpush3.bf16.msra.mxu0 %v615_v4 }
 0x1ff   :  { %806 = vmatmul.mubr.bf16.vlgmr.msra.gmra.mrb[16].mxu0 %v616_v6 }
 0x2d2   :  { %v657_v8 = vpop.f32.mrb[16].mxu0 }
 0x2d3   :  { %v658_v10 = vadd.f32 %v657_v8, %v621_v7  ;;  %v807_v11 = vpop.f32.mrb[17].mxu0 }
 0x2d4   :  { %v660_v12 = vpop.f32.mrb[18].mxu0 }
 0x2d5   :  { %v808_v13 = vpop.f32.mrb[19].mxu0  ;;  %v665_v14 = vmul.f32 %v664_v9, %v658_v10 }
 0x2d7   :  { %666 = vst [vmem:[#allocation3] sm:$0xff] %v665_v14 }
 0x2d8   :  { %843 = shalt.err (!%p840_p4)
}
 0x2d9   :  { %s844_s0 = scalar_lea.hbm %s1098_s8, 128 }
 0x2da   :  { %p845_p5 = scmp.ne.s32.totalorder %s1098_s8, %s844_s0  ;;  %p848_p6 = scmp.lt.u32.totalorder %s844_s0, %s1098_s8 }
 0x2dc   :  { %p850_p7 = pnand %p848_p6, %p845_p5 }
 0x2de   :  { %853 = shalt.err (!%p850_p7)
}
 0x2df   :  { %676 = dma.vmem_to_hbm [thread:$0]  %s674_s10, 128, %s1098_s8, [#allocation4]  }
 0x2e0   :  { %854 = dma.done.wait [#allocation4], 128  }
 0x2e1   :  { %855 = vsyncadd [#allocation4], 4294967168 }
 0x2e2   :  { %680 = vsyncpa [#allocation4], 1 }

</bundles_post_ra>
